<compile_context>
chip_gen: v5e
topology: v5e:2x2
jax: 0.10.0
libtpu: 0.0.40
codegen_flags: <defaults>
</compile_context>

<pallas_src>
import jax
import jax.numpy as jnp
from jax.experimental import pallas as pl
from jax.experimental.pallas import tpu as pltpu


def linear_kernel(x_ref, w_ref, b_ref, o_ref):
    """y[0, n] = sum_i w[i] * x[i, n] + b   (batch n on the lane axis).

    x_ref: (IN, TB) VMEM, feature-major (features on sublanes, batch on lanes).
    w_ref: (IN,)    SMEM scalars.
    b_ref: (1,)     SMEM scalar.
    o_ref: (1, TB)  VMEM, lane-dense output row.
    """
    n_in = x_ref.shape[0]              # static (= 10)
    acc = x_ref[0:1, :] * w_ref[0]     # (1, TB) VPU scalar*row
    for i in range(1, n_in):           # static unroll: 10 VPU FMAs, no XLU reduce
        acc = acc + x_ref[i:i + 1, :] * w_ref[i]
    o_ref[...] = (acc + b_ref[0]).astype(o_ref.dtype)


def mynet_forward(x, weight, bias, *, tb=32768):
    """Forward of nn.Linear(10, 1): x (B, 10) @ weight.T + bias -> (B, 1).

    weight: (1, 10) native PyTorch layout; bias: (1,).
    """
    B, n_in = x.shape
    n_out = weight.shape[0]            # = 1

    # Layout plumbing (wrapper-side, not compute): put batch on the lane axis
    # and flatten the weight row to scalars for SMEM.
    x_t = x.T                          # (IN, B), feature-major
    w_flat = weight.reshape(n_in)      # (IN,)

    if B <= tb:
        # Gridless path: whole arrays in VMEM, zero per-step grid overhead.
        out = pl.pallas_call(
            linear_kernel,
            out_shape=jax.ShapeDtypeStruct((n_out, B), x.dtype),
            in_specs=[
                pl.BlockSpec(memory_space=pltpu.MemorySpace.VMEM),   # x_t (whole)
                pl.BlockSpec(memory_space=pltpu.MemorySpace.SMEM),   # weights
                pl.BlockSpec(memory_space=pltpu.MemorySpace.SMEM),   # bias
            ],
            out_specs=pl.BlockSpec(memory_space=pltpu.MemorySpace.VMEM),
        )(x_t, w_flat, bias)
    else:
        # Large-batch path: stream lane-dense (IN, tb) tiles; HBM-bound.
        grid = (pl.cdiv(B, tb),)
        out = pl.pallas_call(
            linear_kernel,
            out_shape=jax.ShapeDtypeStruct((n_out, B), x.dtype),
            grid=grid,
            in_specs=[
                pl.BlockSpec((n_in, tb), lambda i: (0, i)),          # x tile
                pl.BlockSpec(memory_space=pltpu.MemorySpace.SMEM),   # weights (const)
                pl.BlockSpec(memory_space=pltpu.MemorySpace.SMEM),   # bias (const)
            ],
            out_specs=pl.BlockSpec((n_out, tb), lambda i: (0, i)),   # lane-dense out
            compiler_params=pltpu.CompilerParams(
                dimension_semantics=("parallel",)),                  # 2 TCs on v7x
        )(x_t, w_flat, bias)

    return out.T                       # (B, 1)


if __name__ == "__main__":
    key = jax.random.PRNGKey(0)
    kx, kw, kb = jax.random.split(key, 3)

    IN, OUT = 10, 1

    # nn.Linear default init: uniform(-1/sqrt(in_features), +1/sqrt(in_features)).
    bound = 1.0 / jnp.sqrt(jnp.float32(IN))
    weight = jax.random.uniform(kw, (OUT, IN), jnp.float32, -bound, bound)
    bias = jax.random.uniform(kb, (OUT,), jnp.float32, -bound, bound)

    # Small-batch (gridless) path.
    B = 8
    x = jax.random.normal(kx, (B, IN), jnp.float32)
    out = jax.block_until_ready(mynet_forward(x, weight, bias))
    ref = x @ weight.T + bias
    assert out.shape == (B, OUT)
    assert jnp.allclose(out, ref, atol=1e-5, rtol=1e-5)

    # Gridded (tiled) path, exercised with a small tile and a last partial block
    # (B not a multiple of tb) to validate masking on the final tile.
    B2 = 300
    x2 = jax.random.normal(kx, (B2, IN), jnp.float32)
    out2 = jax.block_until_ready(mynet_forward(x2, weight, bias, tb=128))
    ref2 = x2 @ weight.T + bias
    assert out2.shape == (B2, OUT)
    assert jnp.allclose(out2, ref2, atol=1e-5, rtol=1e-5)

    print("KERNEL_OK")
</pallas_src>

<mosaic_0001>
module attributes {stable_mosaic.version = 11 : i64} {
  func.func @linear_kernel(%arg0: memref<10x8xf32, #tpu.memory_space<vmem>>, %arg1: memref<10xf32, #tpu.memory_space<smem>>, %arg2: memref<1xf32, #tpu.memory_space<smem>>, %arg3: memref<1x8xf32, #tpu.memory_space<vmem>>) attributes {dimension_semantics = [], scalar_prefetch = 0 : i64, scratch_operands = 0 : i64, tpu.core_type = #tpu.core_type<tc>} {
    %c0 = arith.constant 0 : index
    %c0_0 = arith.constant 0 : index
    %0 = vector.load %arg0[%c0, %c0_0] : memref<10x8xf32, #tpu.memory_space<vmem>>, vector<1x8xf32>
    %c0_1 = arith.constant 0 : index
    %1 = memref.load %arg1[%c0_1] : memref<10xf32, #tpu.memory_space<smem>>
    %2 = vector.broadcast %1 : f32 to vector<1x8xf32>
    %3 = arith.mulf %0, %2 : vector<1x8xf32>
    %c1 = arith.constant 1 : index
    %c0_2 = arith.constant 0 : index
    %4 = vector.load %arg0[%c1, %c0_2] : memref<10x8xf32, #tpu.memory_space<vmem>>, vector<1x8xf32>
    %c1_3 = arith.constant 1 : index
    %5 = memref.load %arg1[%c1_3] : memref<10xf32, #tpu.memory_space<smem>>
    %6 = vector.broadcast %5 : f32 to vector<1x8xf32>
    %7 = arith.mulf %4, %6 : vector<1x8xf32>
    %8 = arith.addf %3, %7 : vector<1x8xf32>
    %c2 = arith.constant 2 : index
    %c0_4 = arith.constant 0 : index
    %9 = vector.load %arg0[%c2, %c0_4] : memref<10x8xf32, #tpu.memory_space<vmem>>, vector<1x8xf32>
    %c2_5 = arith.constant 2 : index
    %10 = memref.load %arg1[%c2_5] : memref<10xf32, #tpu.memory_space<smem>>
    %11 = vector.broadcast %10 : f32 to vector<1x8xf32>
    %12 = arith.mulf %9, %11 : vector<1x8xf32>
    %13 = arith.addf %8, %12 : vector<1x8xf32>
    %c3 = arith.constant 3 : index
    %c0_6 = arith.constant 0 : index
    %14 = vector.load %arg0[%c3, %c0_6] : memref<10x8xf32, #tpu.memory_space<vmem>>, vector<1x8xf32>
    %c3_7 = arith.constant 3 : index
    %15 = memref.load %arg1[%c3_7] : memref<10xf32, #tpu.memory_space<smem>>
    %16 = vector.broadcast %15 : f32 to vector<1x8xf32>
    %17 = arith.mulf %14, %16 : vector<1x8xf32>
    %18 = arith.addf %13, %17 : vector<1x8xf32>
    %c4 = arith.constant 4 : index
    %c0_8 = arith.constant 0 : index
    %19 = vector.load %arg0[%c4, %c0_8] : memref<10x8xf32, #tpu.memory_space<vmem>>, vector<1x8xf32>
    %c4_9 = arith.constant 4 : index
    %20 = memref.load %arg1[%c4_9] : memref<10xf32, #tpu.memory_space<smem>>
    %21 = vector.broadcast %20 : f32 to vector<1x8xf32>
    %22 = arith.mulf %19, %21 : vector<1x8xf32>
    %23 = arith.addf %18, %22 : vector<1x8xf32>
    %c5 = arith.constant 5 : index
    %c0_10 = arith.constant 0 : index
    %24 = vector.load %arg0[%c5, %c0_10] : memref<10x8xf32, #tpu.memory_space<vmem>>, vector<1x8xf32>
    %c5_11 = arith.constant 5 : index
    %25 = memref.load %arg1[%c5_11] : memref<10xf32, #tpu.memory_space<smem>>
    %26 = vector.broadcast %25 : f32 to vector<1x8xf32>
    %27 = arith.mulf %24, %26 : vector<1x8xf32>
    %28 = arith.addf %23, %27 : vector<1x8xf32>
    %c6 = arith.constant 6 : index
    %c0_12 = arith.constant 0 : index
    %29 = vector.load %arg0[%c6, %c0_12] : memref<10x8xf32, #tpu.memory_space<vmem>>, vector<1x8xf32>
    %c6_13 = arith.constant 6 : index
    %30 = memref.load %arg1[%c6_13] : memref<10xf32, #tpu.memory_space<smem>>
    %31 = vector.broadcast %30 : f32 to vector<1x8xf32>
    %32 = arith.mulf %29, %31 : vector<1x8xf32>
    %33 = arith.addf %28, %32 : vector<1x8xf32>
    %c7 = arith.constant 7 : index
    %c0_14 = arith.constant 0 : index
    %34 = vector.load %arg0[%c7, %c0_14] : memref<10x8xf32, #tpu.memory_space<vmem>>, vector<1x8xf32>
    %c7_15 = arith.constant 7 : index
    %35 = memref.load %arg1[%c7_15] : memref<10xf32, #tpu.memory_space<smem>>
    %36 = vector.broadcast %35 : f32 to vector<1x8xf32>
    %37 = arith.mulf %34, %36 : vector<1x8xf32>
    %38 = arith.addf %33, %37 : vector<1x8xf32>
    %c8 = arith.constant 8 : index
    %c0_16 = arith.constant 0 : index
    %39 = vector.load %arg0[%c8, %c0_16] : memref<10x8xf32, #tpu.memory_space<vmem>>, vector<1x8xf32>
    %c8_17 = arith.constant 8 : index
    %40 = memref.load %arg1[%c8_17] : memref<10xf32, #tpu.memory_space<smem>>
    %41 = vector.broadcast %40 : f32 to vector<1x8xf32>
    %42 = arith.mulf %39, %41 : vector<1x8xf32>
    %43 = arith.addf %38, %42 : vector<1x8xf32>
    %c9 = arith.constant 9 : index
    %c0_18 = arith.constant 0 : index
    %44 = vector.load %arg0[%c9, %c0_18] : memref<10x8xf32, #tpu.memory_space<vmem>>, vector<1x8xf32>
    %c9_19 = arith.constant 9 : index
    %45 = memref.load %arg1[%c9_19] : memref<10xf32, #tpu.memory_space<smem>>
    %46 = vector.broadcast %45 : f32 to vector<1x8xf32>
    %47 = arith.mulf %44, %46 : vector<1x8xf32>
    %48 = arith.addf %43, %47 : vector<1x8xf32>
    %c0_20 = arith.constant 0 : index
    %49 = memref.load %arg2[%c0_20] : memref<1xf32, #tpu.memory_space<smem>>
    %50 = vector.broadcast %49 : f32 to vector<1x8xf32>
    %51 = arith.addf %48, %50 : vector<1x8xf32>
    %c0_21 = arith.constant 0 : index
    %c0_22 = arith.constant 0 : index
    %52 = vector.load %arg3[%c0_21, %c0_22] : memref<1x8xf32, #tpu.memory_space<vmem>>, vector<1x8xf32>
    tpu.vector_store %arg3[%c0_21, %c0_22], %51 {strides = array<i32>} : memref<1x8xf32, #tpu.memory_space<vmem>>, vector<1x8xf32>,
    return
  }
}

</mosaic_0001>

<bundles_post_ra>
// kernel: tpu_custom_call.1
= control target key start
LH: loop header
LB: loop body
LE: loop exit
PB: predicated region body
PF: predicated region fallthrough
CT: control target
= control target key end

     0   :  { %9 = vsyncpa [#allocation5], 0  ;;  %s212_s0 = inlined_call_operand.vmem [shape: f32[10,8], index: 0, kind: input, shape index: {}]   ;;  %s213_s1 = inlined_call_operand.vmem [shape: f32[10], index: 1, kind: input, shape index: {}]   ;;  %s214_s2 = inlined_call_operand.<no memory space> [shape: f32[1], index: 2, kind: input, shape index: {}]   ;;  %s215_s3 = inlined_call_operand.hbm [shape: f32[1,8], index: 3, kind: output, shape index: {}]  }
   0x1   :  { %10 = vsyncpa [#allocation4], 0  ;;  %s18_s14 = sshll.u32 %s213_s1, 4  ;;  %s151_s15 = smov [#allocation3]   ;;  %s19_s14 = int_to_ptr.vmem [resolvable:$true] %s18_s14 }
   0x2   :  { %21 = dma.vmem_to_smem %s19_s14, 16, %s151_s15, [#allocation5]  }
   0x3   :  { %147 = dma.done.wait [#allocation5], 16  }
   0x4   :  { %148 = vsyncadd [#allocation5], 4294967280 }
   0x5   :  { %28 = sfence }
   0x6   :  { %s30_s16 = sld [smem:[#allocation3]]  ;;  %v29_v0 = vld [vmem:[%s212_s0] sm:$0x1]  ;;  %v33_v1 = vld [vmem:[%s212_s0 + $0x1] sm:$0x1]  ;;  %v79_v38 = vstv %s214_s2  ;;  %s152_s20 = smov [#allocation6]  }
   0x7   :  { %s100_s17 = sld [smem:[#allocation3 + $0x1]]  ;;  %v38_v3 = vld [vmem:[%s212_s0 + $0x2] sm:$0x1]  ;;  %v43_v6 = vld [vmem:[%s212_s0 + $0x3] sm:$0x1]  ;;  %s88_s21 = sshll.u32 %s152_s20, 4  ;;  %s89_s21 = int_to_ptr.vmem [resolvable:$true] %s88_s21 }
   0x8   :  { %s101_s18 = sld [smem:[#allocation3 + $0x2]]  ;;  %v48_v11 = vld [vmem:[%s212_s0 + $0x4] sm:$0x1]  ;;  %v53_v15 = vld [vmem:[%s212_s0 + $0x5] sm:$0x1]  ;;  %s90_s24 = sshll.u32 %s215_s3, 4  ;;  %s91_s24 = int_to_ptr.hbm [resolvable:$true] %s90_s24 }
   0x9   :  { %s102_s19 = sld [smem:[#allocation3 + $0x3]]  ;;  %v58_v19 = vld [vmem:[%s212_s0 + $0x6] sm:$0x1]  ;;  %v63_v23 = vld [vmem:[%s212_s0 + $0x7] sm:$0x1]  ;;  %vm81_vm0 = vcmask 57344  }
   0xa   :  { %s103_s22 = sld [smem:[#allocation3 + $0x4]]  ;;  %v68_v27 = vld [vmem:[%s212_s0 + $0x8] sm:$0x1]  ;;  %v73_v31 = vld [vmem:[%s212_s0 + $0x9] sm:$0x1] }
   0xb   :  { %s104_s1 = sld [smem:[#allocation3 + $0x5]] }
   0xc   :  { %v31_v2 = vstv %s30_s16  ;;  %s105_s27 = sld [smem:[#allocation3 + $0x6]] }
   0xd   :  { %v32_v4 = vmul.f32 %v31_v2, %v29_v0  ;;  %v35_v5 = vstv %s100_s17  ;;  %s106_s30 = sld [smem:[#allocation3 + $0x7]] }
   0xe   :  { %v36_v7 = vmul.f32 %v35_v5, %v33_v1  ;;  %v40_v8 = vstv %s101_s18  ;;  %s107_s6 = sld [smem:[#allocation3 + $0x8]] }
   0xf   :  { %v41_v9 = vmul.f32 %v40_v8, %v38_v3  ;;  %v45_v10 = vstv %s102_s19  ;;  %s108_s9 = sld [smem:[#allocation3 + $0x9]] }
  0x10   :  { %v37_v12 = vadd.f32 %v36_v7, %v32_v4  ;;  %v46_v13 = vmul.f32 %v45_v10, %v43_v6  ;;  %v50_v14 = vstv %s103_s22 }
  0x11   :  { %v55_v16 = vstv %s104_s1  ;;  %v51_v18 = vmul.f32 %v50_v14, %v48_v11 }
  0x12   :  { %v42_v17 = vadd.f32 %v41_v9, %v37_v12  ;;  %v60_v20 = vstv %s105_s27  ;;  %v56_v22 = vmul.f32 %v55_v16, %v53_v15 }
  0x13   :  { %v65_v24 = vstv %s106_s30  ;;  %v61_v26 = vmul.f32 %v60_v20, %v58_v19 }
  0x14   :  { %v47_v21 = vadd.f32 %v46_v13, %v42_v17  ;;  %v70_v28 = vstv %s107_s6  ;;  %v66_v30 = vmul.f32 %v65_v24, %v63_v23 }
  0x15   :  { %v75_v32 = vstv %s108_s9  ;;  %v71_v34 = vmul.f32 %v70_v28, %v68_v27 }
  0x16   :  { %v52_v25 = vadd.f32 %v51_v18, %v47_v21  ;;  %v76_v36 = vmul.f32 %v75_v32, %v73_v31 }
  0x18   :  { %v57_v29 = vadd.f32 %v56_v22, %v52_v25 }
  0x1a   :  { %v62_v33 = vadd.f32 %v61_v26, %v57_v29 }
  0x1c   :  { %v67_v35 = vadd.f32 %v66_v30, %v62_v33 }
  0x1e   :  { %v72_v37 = vadd.f32 %v71_v34, %v67_v35 }
  0x20   :  { %v77_v39 = vadd.f32 %v76_v36, %v72_v37 }
  0x22   :  { %v80_v40 = vadd.f32 %v79_v38, %v77_v39 }
  0x24   :  { %82 = vst.msk [vmem:[#allocation6] sm:$0x1] %vm81_vm0, %v80_v40 }
  0x25   :  { %93 = dma.vmem_to_hbm [thread:$0]  %s89_s21, 16, %s91_s24, [#allocation4]  }
  0x26   :  { %149 = dma.done.wait [#allocation4], 16  }
  0x27   :  { %150 = vsyncadd [#allocation4], 4294967280 }
  0x28   :  { %98 = vsyncpa [#allocation4], 1 }
  0x29   :  { %99 = vsyncpa [#allocation5], 1 }

</bundles_post_ra>
